<compile_context>
chip_gen: v5e
topology: v5e:2x2
jax: 0.10.0
libtpu: 0.0.40
codegen_flags: <defaults>
</compile_context>

<pallas_src>
import jax
import jax.numpy as jnp
from jax.experimental import pallas as pl
from jax.experimental.pallas import tpu as pltpu


_LANES = 1024                 # lane-dense last dim (multiple of 128)
_BLOCK_BYTES = 4 << 20        # ~4 MiB per VMEM buffer (x4 with dbl-buffered in+out)
_VMEM_LIMIT_BYTES = 48 << 20  # below physical VMEM on v5e/v6e (128 MiB) and v7x (64 MiB)


def _round_up(a, b):
    return ((a + b - 1) // b) * b


def _sublanes_for(dtype):
    # Minimum sublane granularity per dtype packing: (8,128) f32, (16,128) bf16,
    # (32,128) int8/fp8.
    itemsize = jnp.dtype(dtype).itemsize
    return {4: 8, 2: 16, 1: 32}.get(itemsize, 8)


def _dimension_semantics():
    # CORE_PARALLEL shards the 1-D grid across both TensorCores on v7x; on
    # single-TC chips (v5e/v6e) plain "parallel" is the safe equivalent.
    try:
        kind = jax.devices()[0].device_kind.lower()
    except Exception:
        kind = ""
    if "v7" in kind or "7x" in kind:
        return (pltpu.CORE_PARALLEL,)
    return ("parallel",)


def _make_kernel(apply_bias, apply_sigmoid):
    def kernel(bias_ref, x_ref, o_ref):
        # bias_ref: (1,) f32 scalar-prefetch SMEM ref; x_ref/o_ref: (rows, _LANES) VMEM.
        z = x_ref[...].astype(jnp.float32)
        if apply_bias:
            z = z + bias_ref[0]
        if apply_sigmoid:
            # sigmoid(z) = 1 / (1 + exp(-z)); exp + exact reciprocal both go to
            # the EUP slot (free: kernel is HBM-bound).  Large negative z ->
            # exp(-z)=inf -> reciprocal -> 0.0 (no NaN).
            z = pl.reciprocal(1.0 + jnp.exp(-z))
        o_ref[...] = z.astype(o_ref.dtype)
    return kernel


def prediction_layer(x, bias=None, *, task="binary", use_bias=True):
    """Pallas implementation of PredictionLayer.forward.

    x:    arbitrary-shaped float logits
    bias: scalar / (1,) parameter (PyTorch nn.Parameter of shape (1,)), used iff use_bias
    """
    if task not in ("binary", "multiclass", "regression"):
        raise ValueError("task must be in binary, multiclass or regression")

    apply_sigmoid = (task == "binary")
    apply_bias = bool(use_bias)
    if not apply_bias and not apply_sigmoid:
        return x  # pure identity path, no kernel needed

    orig_shape = x.shape
    dtype = x.dtype
    itemsize = jnp.dtype(dtype).itemsize
    total = x.size
    if total == 0:
        return x

    sublanes = _sublanes_for(dtype)

    # Flatten to a lane-dense (rows, _LANES) slab.  Pad only to the sublane
    # granularity, not to a whole number of blocks: Pallas masks the ragged
    # trailing grid block, so most real shapes take the no-pad / no-slice fast
    # path and the kernel's read+write is the only HBM traffic.
    n_rows = pl.cdiv(total, _LANES)
    padded_rows = _round_up(n_rows, sublanes)
    padded_total = padded_rows * _LANES

    max_block_rows = max(
        sublanes, (_BLOCK_BYTES // (_LANES * itemsize)) // sublanes * sublanes
    )
    block_rows = min(max_block_rows, padded_rows)

    x_flat = jnp.ravel(x)
    if padded_total != total:
        x_flat = jnp.pad(x_flat, (0, padded_total - total))
    x2d = x_flat.reshape(padded_rows, _LANES)

    # Bias lives in SMEM (32-bit scalar path) as f32 regardless of x dtype.
    if apply_bias:
        bias_arr = jnp.asarray(bias, dtype=jnp.float32).reshape((1,))
    else:
        bias_arr = jnp.zeros((1,), dtype=jnp.float32)

    grid = (pl.cdiv(padded_rows, block_rows),)

    cost = pl.CostEstimate(
        flops=padded_total,
        transcendentals=padded_total if apply_sigmoid else 0,
        bytes_accessed=2 * padded_total * itemsize,
    )

    out2d = pl.pallas_call(
        _make_kernel(apply_bias, apply_sigmoid),
        out_shape=jax.ShapeDtypeStruct((padded_rows, _LANES), dtype),
        grid_spec=pltpu.PrefetchScalarGridSpec(
            num_scalar_prefetch=1,  # bias: DMA'd to SMEM once, before the grid
            grid=grid,
            in_specs=[
                pl.BlockSpec((block_rows, _LANES), lambda i, bias_ref: (i, 0)),
            ],
            out_specs=pl.BlockSpec((block_rows, _LANES),
                                   lambda i, bias_ref: (i, 0)),
        ),
        compiler_params=pltpu.CompilerParams(
            dimension_semantics=_dimension_semantics(),
            vmem_limit_bytes=_VMEM_LIMIT_BYTES,
        ),
        cost_estimate=cost,
    )(bias_arr, x2d)

    out_flat = out2d.reshape(-1)
    if padded_total != total:
        out_flat = out_flat[:total]
    return out_flat.reshape(orig_shape)


if __name__ == "__main__":
    key = jax.random.PRNGKey(0)
    k1, k2, k3 = jax.random.split(key, 3)

    # Logits batch consistent with the module: (batch=8, outputs=128).
    x = jax.random.normal(k1, (8, 128), dtype=jnp.float32)
    bias_zero = jnp.zeros((1,), dtype=jnp.float32)        # nn.Parameter(torch.zeros((1,)))
    bias_nz = jnp.asarray([0.25], dtype=jnp.float32)      # "trained" bias value

    # Binary task: sigmoid(x + bias).
    out = jax.block_until_ready(
        prediction_layer(x, bias_nz, task="binary", use_bias=True))
    ref = jax.nn.sigmoid(x + bias_nz[0])
    assert out.shape == x.shape
    assert jnp.allclose(out, ref, atol=1e-5, rtol=1e-5), "binary path mismatch"

    # Regression task with bias: x + bias.
    out_r = jax.block_until_ready(
        prediction_layer(x, bias_nz, task="regression", use_bias=True))
    assert jnp.allclose(out_r, x + bias_nz[0], atol=1e-6, rtol=1e-6), \
        "regression path mismatch"

    # Regression without bias: identity (no kernel launch).
    out_i = jax.block_until_ready(
        prediction_layer(x, task="regression", use_bias=False))
    assert jnp.allclose(out_i, x), "identity path mismatch"

    # Ragged shape: exercises the minimal-pad + output-slice path and the
    # masked ragged trailing block.
    xr = jax.random.normal(k2, (7, 13), dtype=jnp.float32)
    out_rg = jax.block_until_ready(
        prediction_layer(xr, bias_nz, task="binary", use_bias=True))
    assert jnp.allclose(out_rg, jax.nn.sigmoid(xr + bias_nz[0]),
                        atol=1e-5, rtol=1e-5), "ragged path mismatch"

    # No-pad fast path: total is a multiple of 8*1024 (no jnp.pad / no slice).
    xe = jax.random.normal(k3, (16, 512), dtype=jnp.float32)
    out_e = jax.block_until_ready(
        prediction_layer(xe, bias_zero, task="binary", use_bias=True))
    assert jnp.allclose(out_e, jax.nn.sigmoid(xe), atol=1e-5, rtol=1e-5), \
        "no-pad path mismatch"

    # bf16 path: f32 compute inside, single explicit cast on store.
    xb = jax.random.normal(k1, (8, 128), dtype=jnp.bfloat16)
    out_b = jax.block_until_ready(
        prediction_layer(xb, bias_nz, task="binary", use_bias=True))
    ref_b = jax.nn.sigmoid(xb.astype(jnp.float32) + 0.25).astype(jnp.bfloat16)
    assert jnp.allclose(out_b.astype(jnp.float32), ref_b.astype(jnp.float32),
                        atol=2e-2, rtol=2e-2), "bf16 path mismatch"

    print("KERNEL_OK")
</pallas_src>

<mosaic_0001>
module attributes {stable_mosaic.version = 11 : i64} {
  func.func @kernel(%arg0: i32, %arg1: memref<1xf32, #tpu.memory_space<smem>>, %arg2: memref<8x1024xf32, #tpu.memory_space<vmem>>, %arg3: memref<8x1024xf32, #tpu.memory_space<vmem>>) attributes {dimension_semantics = [#tpu.dimension_semantics<parallel>], iteration_bounds = array<i64: 1>, scalar_prefetch = 1 : i64, scratch_operands = 0 : i64, tpu.core_type = #tpu.core_type<tc>, window_params = [{transform_indices = @transform_0, window_bounds = array<i64: 8, 1024>}, {transform_indices = @transform_1, window_bounds = array<i64: 8, 1024>}]} {
    %c0 = arith.constant 0 : index
    %c0_0 = arith.constant 0 : index
    %0 = vector.load %arg2[%c0, %c0_0] : memref<8x1024xf32, #tpu.memory_space<vmem>>, vector<8x1024xf32>
    %c0_1 = arith.constant 0 : index
    %1 = memref.load %arg1[%c0_1] : memref<1xf32, #tpu.memory_space<smem>>
    %2 = vector.broadcast %1 : f32 to vector<8x1024xf32>
    %3 = arith.addf %0, %2 : vector<8x1024xf32>
    %cst = arith.constant 0.000000e+00 : f32
    %4 = vector.broadcast %cst : f32 to vector<8x1024xf32>
    %5 = arith.subf %4, %3 : vector<8x1024xf32>
    %6 = math.exp %5 : vector<8x1024xf32>
    %cst_2 = arith.constant 1.000000e+00 : f32
    %7 = vector.broadcast %cst_2 : f32 to vector<8x1024xf32>
    %8 = arith.addf %7, %6 : vector<8x1024xf32>
    %9 = tpu.reciprocal %8 : vector<8x1024xf32> -> vector<8x1024xf32>
    %c0_3 = arith.constant 0 : index
    %c0_4 = arith.constant 0 : index
    %10 = vector.load %arg3[%c0_3, %c0_4] : memref<8x1024xf32, #tpu.memory_space<vmem>>, vector<8x1024xf32>
    tpu.vector_store %arg3[%c0_3, %c0_4], %9 {strides = array<i32>} : memref<8x1024xf32, #tpu.memory_space<vmem>>, vector<8x1024xf32>,
    return
  }
  func.func @transform_0(%arg0: i32, %arg1: memref<1xf32, #tpu.memory_space<smem>>) -> (i32, i32) {
    %c0_i32 = arith.constant 0 : i32
    %c0_i32_0 = arith.constant 0 : i32
    return %arg0, %c0_i32 : i32, i32
  }
  func.func @transform_1(%arg0: i32, %arg1: memref<1xf32, #tpu.memory_space<smem>>) -> (i32, i32) {
    %c0_i32 = arith.constant 0 : i32
    %c0_i32_0 = arith.constant 0 : i32
    return %arg0, %c0_i32 : i32, i32
  }
}

</mosaic_0001>

<bundles_post_ra>
// kernel: tpu_custom_call.1
= control target key start
LH: loop header
LB: loop body
LE: loop exit
PB: predicated region body
PF: predicated region fallthrough
CT: control target
= control target key end

     0   :  { %8 = vsyncpa [#allocation5], 0  ;;  %s436_s0 = inlined_call_operand.<no memory space> [shape: f32[1], index: 0, kind: input, shape index: {}]   ;;  %s437_s1 = inlined_call_operand.hbm [shape: f32[8,1024], index: 1, kind: input, shape index: {}]   ;;  %s438_s2 = inlined_call_operand.hbm [shape: f32[8,1024], index: 2, kind: output, shape index: {}]  }
   0x1   :  { %9 = vsyncpa [#allocation6], 0  ;;  %s15_s11 = sshll.u32 %s437_s1, 4  ;;  %s298_s12 = smov [#allocation4]   ;;  %s16_s11 = int_to_ptr.hbm [resolvable:$true] %s15_s11 }
   0x2   :  { %s17_s13 = sshll.u32 %s298_s12, 4  ;;  %s18_s13 = int_to_ptr.vmem [resolvable:$true] %s17_s13 }
   0x3   :  { %20 = dma.hbm_to_vmem [thread:$0]  %s16_s11, 1024, %s18_s13, [#allocation5]  }
   0x4   :  { %294 = dma.done.wait [#allocation5], 1024  }
   0x5   :  { %295 = vsyncadd [#allocation5], 4294966272  ;;  %v34_v0 = vstv %s436_s0  ;;  %v25_v1 = vld [vmem:[#allocation4] sm:$0xff]  ;;  %v26_v2 = vld [vmem:[#allocation4 + $0x8] sm:$0xff]  ;;  %s299_s0 = smov [#allocation7]   ;;  %s202_s18 = sshll.u32 %s438_s2, 4  ;;  %s203_s18 = int_to_ptr.hbm [resolvable:$true] %s202_s18 }
   0x6   :  { %v27_v3 = vld [vmem:[#allocation4 + $0x10] sm:$0xff]  ;;  %v35_v4 = vadd.f32 %v34_v0, %v25_v1  ;;  %v36_v5 = vadd.f32 %v34_v0, %v26_v2  ;;  %v28_v7 = vld [vmem:[#allocation4 + $0x18] sm:$0xff]  ;;  %v29_v8 = vld [vmem:[#allocation4 + $0x20] sm:$0xff]  ;;  %s200_s1 = sshll.u32 %s299_s0, 4  ;;  %s201_s1 = int_to_ptr.vmem [resolvable:$true] %s200_s1 }
   0x7   :  { %v37_v6 = vadd.f32 %v34_v0, %v27_v3  ;;  %v30_v9 = vld [vmem:[#allocation4 + $0x28] sm:$0xff]  ;;  %v38_v10 = vadd.f32 %v34_v0, %v28_v7  ;;  %v39_v11 = vadd.f32 %v34_v0, %v29_v8  ;;  %v31_v16 = vld [vmem:[#allocation4 + $0x30] sm:$0xff]  ;;  %v32_v20 = vld [vmem:[#allocation4 + $0x38] sm:$0xff] }
   0x8   :  { %v40_v12 = vadd.f32 %v34_v0, %v30_v9  ;;  %v43_v13 = vsub.f32 0.0, %v35_v4  ;;  %v44_v14 = vsub.f32 0.0, %v36_v5  ;;  %v41_v25 = vadd.f32 %v34_v0, %v31_v16 }
   0x9   :  { %v45_v15 = vsub.f32 0.0, %v37_v6  ;;  %v46_v17 = vsub.f32 0.0, %v38_v10  ;;  %v47_v18 = vsub.f32 0.0, %v39_v11  ;;  %v42_v27 = vadd.f32 %v34_v0, %v32_v20 }
   0xa   :  { %v48_v19 = vsub.f32 0.0, %v40_v12  ;;  %v51_v21 = vmul.f32 1.442695, %v43_v13  ;;  %v53_v22 = vmul.f32 1.442695, %v44_v14  ;;  %v49_v29 = vsub.f32 0.0, %v41_v25 }
   0xb   :  { %v55_v23 = vmul.f32 1.442695, %v45_v15  ;;  %v57_v24 = vmul.f32 1.442695, %v46_v17  ;;  %v59_v26 = vmul.f32 1.442695, %v47_v18 }
   0xc   :  { %214 = vpow2.f32 %v51_v21  ;;  %v61_v28 = vmul.f32 1.442695, %v48_v19  ;;  %v50_v30 = vsub.f32 0.0, %v42_v27  ;;  %v63_v34 = vmul.f32 1.442695, %v49_v29 }
   0xd   :  { %216 = vpow2.f32 %v53_v22 }
   0xe   :  { %218 = vpow2.f32 %v55_v23  ;;  %v65_v37 = vmul.f32 1.442695, %v50_v30 }
   0xf   :  { %220 = vpow2.f32 %v57_v24 }
  0x10   :  { %222 = vpow2.f32 %v59_v26 }
  0x11   :  { %224 = vpow2.f32 %v61_v28 }
  0x12   :  { %v215_v31 = vpop.eup %214 }
  0x13   :  { %v217_v32 = vpop.eup %216  ;;  %v67_v33 = vadd.f32 1.0, %v215_v31 }
  0x14   :  { %v219_v35 = vpop.eup %218  ;;  %v321_v36 = vadd.f32 1.0, %v217_v32 }
  0x15   :  { %v221_v38 = vpop.eup %220  ;;  %226 = vrcp.f32 %v67_v33  ;;  %v84_v40 = vand.u32 2147483647, %v67_v33  ;;  %v86_v42 = vand.u32 2147483648, %v67_v33  ;;  %v324_v43 = vadd.f32 1.0, %v219_v35 }
  0x16   :  { %v223_v39 = vpop.eup %222  ;;  %228 = vrcp.f32 %v321_v36  ;;  %v326_v44 = vadd.f32 1.0, %v221_v38  ;;  %v98_v45 = vand.u32 2147483647, %v321_v36  ;;  %v100_v46 = vand.u32 2147483648, %v321_v36 }
  0x17   :  { %v225_v41 = vpop.eup %224  ;;  %230 = vpow2.f32 %v63_v34  ;;  %v330_v47 = vadd.f32 1.0, %v223_v39  ;;  %vm80_vm0 = vweird.f32 %v67_v33  ;;  %vm94_vm1 = vweird.f32 %v321_v36 }
  0x18   :  { %232 = vpow2.f32 %v65_v37  ;;  %v114_v48 = vand.u32 2147483648, %v324_v43  ;;  %vm335_vm2 = vcmp.eq.f32.partialorder %v84_v40, 8.507059e+37  ;;  %v112_v50 = vand.u32 2147483647, %v324_v43 }
  0x19   :  { %234 = vrcp.f32 %v324_v43  ;;  %v341_v51 = vadd.f32 1.0, %v225_v41  ;;  %v87_v53 = vor.u32 1.1754944e-38, %v86_v42  ;;  %v126_v54 = vand.u32 2147483647, %v326_v44 }
  0x1a   :  { %236 = vrcp.f32 %v326_v44  ;;  %v128_v55 = vand.u32 2147483648, %v326_v44  ;;  %vm346_vm3 = vcmp.eq.f32.partialorder %v98_v45, 8.507059e+37  ;;  %v101_v59 = vor.u32 1.1754944e-38, %v100_v46 }
  0x1b   :  { %v227_v52 = vpop.eup %226  ;;  %238 = vrcp.f32 %v330_v47  ;;  %vm108_vm4 = vweird.f32 %v324_v43  ;;  %v115_v62 = vor.u32 1.1754944e-38, %v114_v48  ;;  %vm122_vm5 = vweird.f32 %v326_v44 }
  0x1c   :  { %v229_v56 = vpop.eup %228  ;;  %v76_v57 = vmul.f32 %v227_v52, %v67_v33  ;;  %v142_v63 = vand.u32 2147483648, %v330_v47  ;;  %vm81_vm6 = vweird.f32 %v227_v52  ;;  %vm354_vm7 = vcmp.eq.f32.partialorder %v112_v50, 8.507059e+37 }
  0x1d   :  { %v231_v60 = vpop.eup %230  ;;  %v90_v61 = vmul.f32 %v229_v56, %v321_v36  ;;  %vm136_vm8 = vweird.f32 %v330_v47  ;;  %240 = vrcp.f32 %v341_v51  ;;  %vm95_vm9 = vweird.f32 %v229_v56  ;;  %vm370_vm12 = vmor %vm80_vm0, %vm81_vm6 }
  0x1e   :  { %v233_v0 = vpop.eup %232  ;;  %v77_v1 = vsub.f32 1.0, %v76_v57  ;;  %vm360_vm10 = vcmp.eq.f32.partialorder %v126_v54, 8.507059e+37  ;;  %v129_v6 = vor.u32 1.1754944e-38, %v128_v55  ;;  %v140_v7 = vand.u32 2147483647, %v330_v47  ;;  %vm378_vm14 = vmor %vm94_vm1, %vm95_vm9 }
  0x1f   :  { %v235_v3 = vpop.eup %234  ;;  %v91_v4 = vsub.f32 1.0, %v90_v61  ;;  %vm150_vm11 = vweird.f32 %v341_v51  ;;  %v154_v11 = vand.u32 2147483647, %v341_v51  ;;  %v143_v16 = vor.u32 1.1754944e-38, %v142_v63 }
  0x20   :  { %v237_v8 = vpop.eup %236  ;;  %v78_v9 = vmul.f32 %v227_v52, %v77_v1  ;;  %v104_v10 = vmul.f32 %v235_v3, %v324_v43  ;;  %vm109_vm13 = vweird.f32 %v235_v3  ;;  %v73_v23 = vadd.f32 1.0, %v231_v60 }
  0x21   :  { %v239_v12 = vpop.eup %238  ;;  %v92_v14 = vmul.f32 %v229_v56, %v91_v4  ;;  %v118_v15 = vmul.f32 %v237_v8, %v326_v44  ;;  %vm123_vm15 = vweird.f32 %v237_v8  ;;  %v385_v28 = vadd.f32 1.0, %v233_v0  ;;  %vm394_vm1 = vmor %vm108_vm4, %vm109_vm13 }
  0x22   :  { %v79_v17 = vadd.f32 %v227_v52, %v78_v9  ;;  %v105_v19 = vsub.f32 1.0, %v104_v10  ;;  %v132_v20 = vmul.f32 %v239_v12, %v330_v47  ;;  %vm137_vm0 = vweird.f32 %v239_v12 }
  0x23   :  { %v93_v21 = vadd.f32 %v229_v56, %v92_v14  ;;  %v119_v22 = vsub.f32 1.0, %v118_v15  ;;  %v241_v24 = vpop.eup %240  ;;  %v156_v38 = vand.u32 2147483648, %v341_v51  ;;  %vm412_vm4 = vmor %vm136_vm8, %vm137_vm0  ;;  %242 = vrcp.f32 %v73_v23 }
  0x24   :  { %v83_v25 = vsel %vm370_vm12, %v227_v52, %v79_v17  ;;  %v106_v26 = vmul.f32 %v235_v3, %v105_v19  ;;  %v133_v27 = vsub.f32 1.0, %v132_v20  ;;  %v146_v33 = vmul.f32 %v241_v24, %v341_v51 }
  0x25   :  { %v88_v29 = vsel %vm335_vm2, %v87_v53, %v83_v25  ;;  %v97_v30 = vsel %vm378_vm14, %v229_v56, %v93_v21  ;;  %v120_v32 = vmul.f32 %v237_v8, %v119_v22  ;;  %vm404_vm2 = vmor %vm122_vm5, %vm123_vm15  ;;  %vm141_vm5 = vcmp.eq.f32.partialorder %v140_v7, 8.507059e+37 }
  0x26   :  { %187 = vst [vmem:[#allocation7] sm:$0xff] %v88_v29  ;;  %v102_v34 = vsel %vm346_vm3, %v101_v59, %v97_v30  ;;  %v107_v35 = vadd.f32 %v235_v3, %v106_v26  ;;  %v134_v37 = vmul.f32 %v239_v12, %v133_v27  ;;  %v147_v41 = vsub.f32 1.0, %v146_v33 }
  0x27   :  { %188 = vst [vmem:[#allocation7 + $0x8] sm:$0xff] %v102_v34  ;;  %v121_v39 = vadd.f32 %v237_v8, %v120_v32  ;;  %vm151_vm3 = vweird.f32 %v241_v24  ;;  %244 = vrcp.f32 %v385_v28  ;;  %v157_v49 = vor.u32 1.1754944e-38, %v156_v38 }
  0x28   :  { %v111_v42 = vsel %vm394_vm1, %v235_v3, %v107_v35  ;;  %v135_v43 = vadd.f32 %v239_v12, %v134_v37  ;;  %v148_v46 = vmul.f32 %v241_v24, %v147_v41  ;;  %vm152_vm6 = vmor %vm150_vm11, %vm151_vm3  ;;  %vm164_vm8 = vweird.f32 %v73_v23 }
  0x29   :  { %v116_v44 = vsel %vm354_vm7, %v115_v62, %v111_v42  ;;  %v125_v45 = vsel %vm404_vm2, %v237_v8, %v121_v39  ;;  %vm155_vm7 = vcmp.eq.f32.partialorder %v154_v11, 8.507059e+37  ;;  %v243_v53 = vpop.eup %242  ;;  %v170_v58 = vand.u32 2147483648, %v73_v23 }
  0x2a   :  { %189 = vst [vmem:[#allocation7 + $0x10] sm:$0xff] %v116_v44  ;;  %v130_v47 = vsel %vm360_vm10, %v129_v6, %v125_v45  ;;  %v139_v48 = vsel %vm412_vm4, %v239_v12, %v135_v43  ;;  %v149_v52 = vadd.f32 %v241_v24, %v148_v46  ;;  %v160_v56 = vmul.f32 %v243_v53, %v73_v23 }
  0x2b   :  { %190 = vst [vmem:[#allocation7 + $0x18] sm:$0xff] %v130_v47  ;;  %v144_v50 = vsel %vm141_vm5, %v143_v16, %v139_v48  ;;  %vm165_vm9 = vweird.f32 %v243_v53  ;;  %v168_v60 = vand.u32 2147483647, %v73_v23  ;;  %vm178_vm10 = vweird.f32 %v385_v28 }
  0x2c   :  { %191 = vst [vmem:[#allocation7 + $0x20] sm:$0xff] %v144_v50  ;;  %v153_v54 = vsel %vm152_vm6, %v241_v24, %v149_v52  ;;  %v161_v59 = vsub.f32 1.0, %v160_v56  ;;  %v184_v61 = vand.u32 2147483648, %v385_v28  ;;  %v182_v0 = vand.u32 2147483647, %v385_v28  ;;  %vm166_vm12 = vmor %vm164_vm8, %vm165_vm9 }
  0x2d   :  { %v158_v55 = vsel %vm155_vm7, %v157_v49, %v153_v54  ;;  %v245_v57 = vpop.eup %244  ;;  %v171_v1 = vor.u32 1.1754944e-38, %v170_v58  ;;  %vm169_vm13 = vcmp.eq.f32.partialorder %v168_v60, 8.507059e+37 }
  0x2e   :  { %192 = vst [vmem:[#allocation7 + $0x28] sm:$0xff] %v158_v55  ;;  %v174_v51 = vmul.f32 %v245_v57, %v385_v28  ;;  %v162_v62 = vmul.f32 %v243_v53, %v161_v59  ;;  %vm179_vm11 = vweird.f32 %v245_v57  ;;  %v185_v4 = vor.u32 1.1754944e-38, %v184_v61 }
  0x2f   :  { %vm180_vm14 = vmor %vm178_vm10, %vm179_vm11  ;;  %vm183_vm15 = vcmp.eq.f32.partialorder %v182_v0, 8.507059e+37 }
  0x30   :  { %v175_v63 = vsub.f32 1.0, %v174_v51  ;;  %v163_v2 = vadd.f32 %v243_v53, %v162_v62 }
  0x32   :  { %v176_v3 = vmul.f32 %v245_v57, %v175_v63  ;;  %v167_v5 = vsel %vm166_vm12, %v243_v53, %v163_v2 }
  0x33   :  { %v172_v7 = vsel %vm169_vm13, %v171_v1, %v167_v5 }
  0x34   :  { %v177_v6 = vadd.f32 %v245_v57, %v176_v3  ;;  %193 = vst [vmem:[#allocation7 + $0x30] sm:$0xff] %v172_v7 }
  0x36   :  { %v181_v8 = vsel %vm180_vm14, %v245_v57, %v177_v6 }
  0x37   :  { %v186_v9 = vsel %vm183_vm15, %v185_v4, %v181_v8 }
  0x38   :  { %194 = vst [vmem:[#allocation7 + $0x38] sm:$0xff] %v186_v9 }
  0x39   :  { %205 = dma.vmem_to_hbm [thread:$0]  %s201_s1, 1024, %s203_s18, [#allocation6]  }
  0x3a   :  { %296 = dma.done.wait [#allocation6], 1024  }
  0x3b   :  { %297 = vsyncadd [#allocation6], 4294966272 }
  0x3c   :  { %210 = vsyncpa [#allocation5], 1 }
  0x3d   :  { %211 = vsyncpa [#allocation6], 1 }

</bundles_post_ra>
